<compile_context>
chip_gen: v6e
topology: v6e:2x2x1
jax: 0.10.0
libtpu: 0.0.40
codegen_flags: <defaults>
</compile_context>

<pallas_src>
import functools

import jax
import jax.numpy as jnp
from jax.experimental import pallas as pl
from jax.experimental.pallas import tpu as pltpu

LATENT_DIM = 32  # small synthetic latent dim for the demo (module default is 512)


# ----------------------------------------------------------------------------- kernel
def _modconv_kernel(w_ref, p_ref, o_ref):
    # w_ref: (1, CoT, KKCin)  pre-modulated/demodulated weight tile for sample b
    # p_ref: (1, KKCin, THW)  im2col patches tile for this (b, hw) grid step
    # o_ref: (1, CoT, THW)    lane-dense output tile
    o_ref[0] = jnp.dot(
        w_ref[0], p_ref[0], preferred_element_type=jnp.float32
    ).astype(o_ref.dtype)


# ----------------------------------------------------------------------------- tiling plan
def _round_up(x, m):
    return ((x + m - 1) // m) * m


def _plan_tiles(cout, kkcin, hw, out_itemsize, mxu_itemsize, hw_tile_cap):
    """Pick (cout_tile, cout_pad, hw_tile, hw_pad, vmem_limit_bytes) from a VMEM budget."""
    try:
        vmem_cap = int(pltpu.get_tpu_info().vmem_capacity_bytes)
    except Exception:
        vmem_cap = 64 * 1024 * 1024  # conservative: v7x per-TensorCore VMEM

    budget = int(vmem_cap * 0.75)  # headroom for compiler temporaries / spills

    # Cout tiling: full when small, else 256-wide "parallel" tiles (MXU-aligned).
    cout_t = cout if cout <= 256 else 256
    cout_pad = _round_up(cout, cout_t)

    # HW tiling: lane-dense multiples of 128, capped, shrunk to fit the budget.
    thw = min(_round_up(hw, 128), _round_up(max(hw_tile_cap, 128), 128))

    def blocks_bytes(t):
        w = cout_t * kkcin * mxu_itemsize
        p = kkcin * t * mxu_itemsize
        o = cout_t * t * out_itemsize
        return 2 * (w + p + o)  # default double-buffered pipeline blocks

    while thw > 128 and blocks_bytes(thw) > budget:
        thw -= 128

    hw_pad = _round_up(hw, thw)
    vmem_limit = int(min(vmem_cap, max(blocks_bytes(thw) + (8 << 20), 32 << 20)))
    return cout_t, cout_pad, thw, hw_pad, vmem_limit


# ----------------------------------------------------------------------------- wrapper
def modulated_conv(x_nchw, w_latent, conv_weight, mod_weight, mod_bias, *,
                   stride=1, padding=0, demodulate=True, upsample=False,
                   mxu_dtype=jnp.bfloat16, hw_tile_cap=1024, out_dtype=None):
    """Matches ModulatedConv.forward(x, w)."""
    B, Cin, H, W = x_nchw.shape
    Cout, _, K, _ = conv_weight.shape
    out_dtype = x_nchw.dtype if out_dtype is None else out_dtype

    if upsample:
        # TODO(synk): verify exact numerical parity of jax.image.resize('bilinear')
        # with F.interpolate(scale_factor=2, mode='bilinear', align_corners=False).
        H, W = 2 * H, 2 * W
        x_nchw = jax.image.resize(x_nchw, (B, Cin, H, W), method="bilinear")

    # ---- XLA glue: modulation linear + weight modulation/demodulation, done ONCE ----
    style = w_latent @ mod_weight.T + mod_bias[None, :]                       # (B, Cin)
    wmod = conv_weight[None].astype(jnp.float32) * style[:, None, :, None, None]
    if demodulate:
        d = jax.lax.rsqrt(jnp.sum(wmod * wmod, axis=(2, 3, 4), keepdims=True) + 1e-8)
        wmod = wmod * d                                                       # (B,Cout,Cin,K,K)
    KKCin = K * K * Cin
    # kk-major / cin-minor flattening to match the im2col patch layout below.
    wmod_flat = jnp.transpose(wmod, (0, 1, 3, 4, 2)).reshape(B, Cout, KKCin)

    # ---- padding + im2col (lane-dense spatial axis) ----
    x_pad = jnp.pad(x_nchw, ((0, 0), (0, 0), (padding, padding), (padding, padding)))
    Hp, Wp = H + 2 * padding, W + 2 * padding
    H_out = (Hp - K) // stride + 1
    W_out = (Wp - K) // stride + 1
    HW = H_out * W_out

    cols = []
    for ky in range(K):
        for kx in range(K):
            s = x_pad[:, :,
                      ky: ky + (H_out - 1) * stride + 1: stride,
                      kx: kx + (W_out - 1) * stride + 1: stride]   # (B, Cin, H_out, W_out)
            cols.append(s.reshape(B, Cin, HW))
    patches = jnp.concatenate(cols, axis=1)                        # (B, KKCin, HW)
    # TODO(synk): at large Cin*HW this HBM-materialized im2col costs K*K x the input
    # bytes; replace with an in-kernel halo scheme (memory_space=pl.ANY on x_pad +
    # pltpu.make_async_copy row-tile DMA + K*K shifted matmuls into an f32 scratch).

    cout_t, cout_pad, thw, hw_pad, vmem_limit = _plan_tiles(
        Cout, KKCin, HW,
        jnp.dtype(out_dtype).itemsize, jnp.dtype(mxu_dtype).itemsize,
        hw_tile_cap)

    if cout_pad != Cout:
        wmod_flat = jnp.pad(wmod_flat, ((0, 0), (0, cout_pad - Cout), (0, 0)))
    if hw_pad != HW:
        patches = jnp.pad(patches, ((0, 0), (0, 0), (0, hw_pad - HW)))

    wmod_flat = wmod_flat.astype(mxu_dtype)
    patches = patches.astype(mxu_dtype)

    n_co = cout_pad // cout_t
    n_hw = hw_pad // thw

    out = pl.pallas_call(
        _modconv_kernel,
        out_shape=jax.ShapeDtypeStruct((B, cout_pad, hw_pad), out_dtype),
        grid_spec=pltpu.PrefetchScalarGridSpec(
            num_scalar_prefetch=0,
            # co innermost: the (large) patch tile is streamed from HBM exactly once.
            grid=(B, n_hw, n_co),
            in_specs=[
                pl.BlockSpec((1, cout_t, KKCin), lambda b, h, co: (b, co, 0)),  # wmod
                pl.BlockSpec((1, KKCin, thw),    lambda b, h, co: (b, 0, h)),   # patches
            ],
            out_specs=pl.BlockSpec((1, cout_t, thw), lambda b, h, co: (b, co, h)),
        ),
        compiler_params=pltpu.CompilerParams(
            dimension_semantics=("parallel", "parallel", "parallel"),
            vmem_limit_bytes=vmem_limit),
    )(wmod_flat, patches)

    out = out[:, :Cout, :HW]                     # crop Cout / HW padding
    return out.reshape(B, Cout, H_out, W_out)    # already NCHW-flattened: reshape only


# ----------------------------------------------------------------------------- reference
def _reference(x, w_lat, weight, mod_w, mod_b, *, padding, stride, demodulate,
               upsample=False):
    """Pure-JAX reference mirroring the PyTorch forward (grouped conv per sample)."""
    B, Cin, H, W = x.shape
    if upsample:
        x = jax.image.resize(x, (B, Cin, 2 * H, 2 * W), method="bilinear")
    style = w_lat @ mod_w.T + mod_b                                  # (B, Cin)
    wmod = weight[None] * style[:, None, :, None, None]              # (B, Cout, Cin, K, K)
    if demodulate:
        d = jax.lax.rsqrt(jnp.sum(wmod ** 2, axis=(2, 3, 4), keepdims=True) + 1e-8)
        wmod = wmod * d
    outs = []
    for b in range(B):
        y = jax.lax.conv_general_dilated(
            x[b:b + 1], wmod[b],
            window_strides=(stride, stride),
            padding=[(padding, padding), (padding, padding)],
            dimension_numbers=('NCHW', 'OIHW', 'NCHW'))
        outs.append(y)
    return jnp.concatenate(outs, axis=0)


if __name__ == "__main__":
    # Small shapes consistent with the module.
    B, Cin, Cout, K, H, W = 2, 4, 8, 3, 16, 16
    L = LATENT_DIM

    key = jax.random.PRNGKey(0)
    k_x, k_w, k_cw, k_mw = jax.random.split(key, 4)

    x = jax.random.normal(k_x, (B, Cin, H, W), jnp.float32)          # NCHW input
    w_lat = jax.random.normal(k_w, (B, L), jnp.float32)              # latent codes

    # kaiming_normal_(fan_in, leaky_relu a=0) -> std = sqrt(2 / (Cin*K*K))
    kaiming_std = (2.0 / (Cin * K * K)) ** 0.5
    conv_weight = kaiming_std * jax.random.normal(k_cw, (Cout, Cin, K, K), jnp.float32)
    mod_weight = 0.02 * jax.random.normal(k_mw, (Cin, L), jnp.float32)
    mod_bias = jnp.zeros((Cin,), jnp.float32)

    configs = [
        # (kernel kwargs, tolerance)
        (dict(stride=1, padding=1, demodulate=True, upsample=False,
              mxu_dtype=jnp.float32), 1e-4),      # tight correctness check
        (dict(stride=1, padding=1, demodulate=True, upsample=False,
              mxu_dtype=jnp.bfloat16), 1e-1),     # fast bf16-MXU path (looser tol)
        (dict(stride=2, padding=1, demodulate=True, upsample=False,
              mxu_dtype=jnp.float32), 1e-4),      # exercises strided im2col + HW padding
        (dict(stride=1, padding=1, demodulate=False, upsample=True,
              mxu_dtype=jnp.float32), 1e-4),      # exercises upsample + no demod
    ]

    for cfg, tol in configs:
        out = modulated_conv(x, w_lat, conv_weight, mod_weight, mod_bias, **cfg)
        out = jax.block_until_ready(out)
        ref = _reference(x, w_lat, conv_weight, mod_weight, mod_bias,
                         padding=cfg["padding"], stride=cfg["stride"],
                         demodulate=cfg["demodulate"], upsample=cfg["upsample"])
        ref = jax.block_until_ready(ref)
        assert out.shape == ref.shape, (cfg, out.shape, ref.shape)
        max_err = float(jnp.max(jnp.abs(out - ref)))
        assert jnp.allclose(out, ref, atol=tol, rtol=tol), (cfg, max_err)

    print("KERNEL_OK")
</pallas_src>

<mosaic_0001>
module attributes {stable_mosaic.version = 11 : i64} {
  func.func @_modconv_kernel(%arg0: i32, %arg1: i32, %arg2: i32, %arg3: memref<1x8x36xf32, #tpu.memory_space<vmem>>, %arg4: memref<1x36x256xf32, #tpu.memory_space<vmem>>, %arg5: memref<1x8x256xf32, #tpu.memory_space<vmem>>) attributes {dimension_semantics = [#tpu.dimension_semantics<parallel>, #tpu.dimension_semantics<parallel>, #tpu.dimension_semantics<parallel>], iteration_bounds = array<i64: 2, 1, 1>, scalar_prefetch = 0 : i64, scratch_operands = 0 : i64, tpu.core_type = #tpu.core_type<tc>, window_params = [{transform_indices = @transform_0, window_bounds = array<i64: 1, 8, 36>}, {transform_indices = @transform_1, window_bounds = array<i64: 1, 36, 256>}, {transform_indices = @transform_2, window_bounds = array<i64: 1, 8, 256>}]} {
    %c0 = arith.constant 0 : index
    %c0_0 = arith.constant 0 : index
    %c0_1 = arith.constant 0 : index
    %0 = vector.load %arg3[%c0, %c0_0, %c0_1] : memref<1x8x36xf32, #tpu.memory_space<vmem>>, vector<1x8x36xf32>
    %1 = vector.shape_cast %0 : vector<1x8x36xf32> to vector<8x36xf32>
    %c0_2 = arith.constant 0 : index
    %c0_3 = arith.constant 0 : index
    %c0_4 = arith.constant 0 : index
    %2 = vector.load %arg4[%c0_2, %c0_3, %c0_4] : memref<1x36x256xf32, #tpu.memory_space<vmem>>, vector<1x36x256xf32>
    %3 = vector.shape_cast %2 : vector<1x36x256xf32> to vector<36x256xf32>
    %cst = arith.constant dense<0.000000e+00> : vector<8x256xf32>
    %4 = tpu.matmul %1, %3, %cst {dimension_numbers = #tpu.dot_dimension_numbers<[1], [0], [0], [1], [0, 0, 1, 1], [], []>} : vector<8x36xf32>, vector<36x256xf32>, vector<8x256xf32> -> vector<8x256xf32>
    %c0_5 = arith.constant 0 : index
    %c0_6 = arith.constant 0 : index
    %c0_7 = arith.constant 0 : index
    %5 = vector.load %arg5[%c0_5, %c0_6, %c0_7] : memref<1x8x256xf32, #tpu.memory_space<vmem>>, vector<1x8x256xf32>
    %6 = vector.shape_cast %5 : vector<1x8x256xf32> to vector<8x256xf32>
    %7 = vector.shape_cast %4 : vector<8x256xf32> to vector<1x8x256xf32>
    tpu.vector_store %arg5[%c0_5, %c0_6, %c0_7], %7 {strides = array<i32>} : memref<1x8x256xf32, #tpu.memory_space<vmem>>, vector<1x8x256xf32>,
    return
  }
  func.func @transform_0(%arg0: i32, %arg1: i32, %arg2: i32) -> (i32, i32, i32) {
    %c0_i32 = arith.constant 0 : i32
    %c0_i32_0 = arith.constant 0 : i32
    return %arg0, %arg2, %c0_i32 : i32, i32, i32
  }
  func.func @transform_1(%arg0: i32, %arg1: i32, %arg2: i32) -> (i32, i32, i32) {
    %c0_i32 = arith.constant 0 : i32
    %c0_i32_0 = arith.constant 0 : i32
    return %arg0, %c0_i32, %arg1 : i32, i32, i32
  }
  func.func @transform_2(%arg0: i32, %arg1: i32, %arg2: i32) -> (i32, i32, i32) {
    %c0_i32 = arith.constant 0 : i32
    return %arg0, %arg2, %arg1 : i32, i32, i32
  }
}

</mosaic_0001>

<bundles_post_ra>
// kernel: tpu_custom_call.1
= control target key start
LH: loop header
LB: loop body
LE: loop exit
PB: predicated region body
PF: predicated region fallthrough
CT: control target
= control target key end

     0   :  { %7 = vsyncpa [#allocation3], 0  ;;  %s697_s0 = inlined_call_operand.vmem [shape: f32[2,8,36], index: 0, kind: input, shape index: {}]   ;;  %s698_s1 = inlined_call_operand.vmem [shape: f32[2,36,256], index: 1, kind: input, shape index: {}]   ;;  %s699_s2 = inlined_call_operand.hbm [shape: f32[2,8,256], index: 2, kind: output, shape index: {}]  }
   0x1   :  { %9 = vsyncpa [#allocation3 + $0x1], 0  ;;  %s589_s9 = smov 0   ;;  %s591_s10 = smov 0  }
   0x2   :  { %s593_s11 = smov 0   ;;  %s595_s12 = smov 0  }
   0x3   :  { %s597_s13 = smov 0   ;;  %s599_s14 = smov 0  }
   0x4 LB: > { %s420_s15 = sadd.s32 4294967295, %s570_s14   ;;  %s421_s16 = sadd.s32 4294967294, %s570_s14   ;;  %s570_s14 = sphi %s599_s14, %s15_s14   ;;  %s566_s13 = sphi %s597_s13, %s706_s13   ;;  %s562_s12 = sphi %s595_s12, %s705_s12   ;;  %s558_s11 = sphi %s593_s11, %s704_s11   ;;  %s554_s10 = sphi %s591_s10, %s703_s10   ;;  %s550_s9 = sphi %s589_s9, %s702_s9  }
   0x5   : > { %s34_s17 = sadd.s32 1, %s566_s13  ;;  %s101_s18 = sadd.s32 1, %s558_s11 }
   0x6   : > { %p36_p0 = scmp.ge.s32.totalorder %s34_s17, 2  ;;  %p111_p1 = scmp.ne.s32.totalorder %s558_s11, %s554_s10 }
   0x7   : > { %p112_p2 = scmp.eq.s32.totalorder %s420_s15, 1  ;;  %p117_p3 = scmp.ne.s32.totalorder %s554_s10, %s550_s9 }
   0x8   : > { %s708_s17 = smov (%p36_p0, %s34_s17), 0  ;;  %p118_p5 = scmp.eq.s32.totalorder %s421_s16, 1 }
   0x9   : > { %p629_p4 = por %p112_p2, %p111_p1  ;;  %s94_s20 = ssub.s32 %s566_s13, %s708_s17 }
   0xa   : > { %p424_p6 = scmp.ge.s32.totalorder %s570_s14, 1  ;;  %p99_p7 = scmp.eq.s32.totalorder %s94_s20, 0 }
   0xb   : > { %p636_p8 = por %p118_p5, %p117_p3  ;;  %p159_p9 = scmp.lt.s32.totalorder %s570_s14, 3 }
   0xc   : > { %s642_s22 = scalar_select %p99_p7, %s558_s11, %s101_s18  }
   0xd   : > { %p160_p10 = pnand %p424_p6, %p159_p9 }
   0xe   : > { %p192_p11 = scmp.lt.s32.totalorder (!%p160_p10), %s562_s12, 1  ;;  %s189_s4 = sand.u32 (!%p160_p10), 1, %s554_s10  }
   0xf   : > { %163 = sbr.rel (%p160_p10) target bundleno = 244 (0xf4), region = 28  ;;  %s425_s5 = sshll.u32 (!%p160_p10), %s189_s4, 4 }
  0x10   : > { %s191_s6 = scalar_lea.vmem (!%p160_p10), [#allocation2], %s425_s5  ;;  %s436_s8 = sshll.u32 (!%p160_p10), %s562_s12, 8 }
  0x11   : > { %s324_s7 = sshll.u32 (!%p160_p10), %s191_s6, 4  ;;  %s322_s18 = scalar_lea.hbm (!%p160_p10), %s699_s2, %s436_s8  ;;  %s654_s7 = int_to_ptr.vmem [resolvable:$true] %s324_s7 }
  0x12   : > { %s306_s20 = scalar_lea.sflag (!%p160_p10), [#allocation3], %s189_s4 }
  0x14   : > { %v572_v0 = vmov 0.0   ;;  %s193_s23 = scalar_select %p192_p11, %s562_s12, 1  ;;  %vm225_vm0 = vcmask 1043456   ;;  %vm221_vm1 = vcmask 293888  }
  0x15   : > { %296 = vmatprep.mubr.f32.mxu0 %v572_v0  ;;  %s573_s12 = smov [#allocation2]  }
  0x16   : > { %s437_s24 = smul.u32 80, %s193_s23  ;;  %s426_s28 = sshll.u32 %s193_s23, 3 }
  0x17   : > { %s198_s3 = scalar_lea.vmem %s697_s0, %s426_s28  ;;  %s494_s23 = scalar_lea.vmem %s654_s7, 256 }
  0x18   : > { %s207_s27 = scalar_lea.vmem %s698_s1, %s437_s24  ;;  %v210_v11 = vld [vmem:[%s198_s3] sm:$0xff]  ;;  %p495_p12 = scmp.ne.s32.totalorder %s654_s7, %s494_s23 }
  0x19   : > { %v220_v1 = vld [vmem:[%s207_s27 + $0x48] sm:$0xf]  ;;  %v219_v2 = vld [vmem:[%s207_s27 + $0x40] sm:$0xf]  ;;  %v218_v3 = vld [vmem:[%s207_s27 + $0x38] sm:$0xff]  ;;  %s498_s24 = sshll.u32 %s573_s12, 4  ;;  %s499_s24 = int_to_ptr.vmem [resolvable:$false] %s498_s24 }
  0x1a   : > { %428 = vmatprep.subr.msk.mxu0 %vm225_vm0, %v220_v1  ;;  %v217_v4 = vld [vmem:[%s207_s27 + $0x30] sm:$0xff]  ;;  %v216_v5 = vld [vmem:[%s207_s27 + $0x28] sm:$0xff]  ;;  %v215_v6 = vld [vmem:[%s207_s27 + $0x20] sm:$0xff]  ;;  %p496_p13 = pnand %p495_p12, %p629_p4  ;;  %s500_s25 = scalar_lea.vmem %s499_s24, 512 }
  0x1b   : > { %429 = vmatpush1.msk.msra.mxu0 %vm225_vm0, %v219_v2  ;;  %v214_v7 = vld [vmem:[%s207_s27 + $0x18] sm:$0xff]  ;;  %v213_v8 = vld [vmem:[%s207_s27 + $0x10] sm:$0xff]  ;;  %v212_v9 = vld [vmem:[%s207_s27 + $0x8] sm:$0xff]  ;;  %p501_p1 = scmp.lt.s32.totalorder %s654_s7, %s499_s24  ;;  %p502_p2 = scmp.lt.s32.totalorder %s500_s25, %s494_s23 }
  0x1c   : > { %256 = vmatprep.subr.mxu0 %v218_v3  ;;  %v211_v10 = vld [vmem:[%s207_s27] sm:$0xff]  ;;  %p497_p0 = pneg %p496_p13 }
  0x1d   : > { %257 = vmatpush1.msra.mxu0 %v217_v4  ;;  %p503_p3 = por %p502_p2, %p501_p1 }
  0x1e   : > { %258 = vmatprep.subr.mxu0 %v216_v5 }
  0x1f   : > { %259 = vmatpush1.msra.mxu0 %v215_v6  ;;  %p504_p5 = pnand %p503_p3, %p497_p0 }
  0x20   : > { %260 = vmatprep.subr.mxu0 %v214_v7 }
  0x21   : > { %261 = vmatpush1.msra.mxu0 %v213_v8 }
  0x22   : > { %262 = vmatprep.subr.mxu0 %v212_v9 }
  0x23   : > { %263 = vmatpush1.msra.mxu0 %v211_v10 }
  0x24   : > { %430 = vmatmul.mubr.msk.f32.vlgmr.msra.gmra.mxu0 %vm221_vm1, %v210_v11 }
  0xe4   : > { %v298_v12 = vpop.f32.mrf.mxu0 }
  0xe5   : > { %303 = vst [vmem:[%s191_s6] sm:$0xff] %v298_v12 }
  0xe6   : > { %v300_v13 = vpop.f32.mrf.mxu0 }
  0xe7   : > { %304 = vst [vmem:[%s191_s6 + $0x8] sm:$0xff] %v300_v13 }
  0xe8   : > { %507 = shalt.err (!%p504_p5)
}
  0xe9   : > { %s508_s26 = scalar_lea.hbm %s322_s18, 256  ;;  %s512_s29 = scalar_lea.hbm %s699_s2, 512 }
  0xea   : > { %p509_p6 = scmp.ne.s32.totalorder %s322_s18, %s508_s26  ;;  %p513_p10 = scmp.lt.s32.totalorder %s322_s18, %s699_s2 }
  0xeb   : > { %p514_p11 = scmp.lt.s32.totalorder %s512_s29, %s508_s26 }
  0xec   : > { %p510_p7 = pnand %p509_p6, %p629_p4 }
  0xed   : > { %p515_p12 = por %p514_p11, %p513_p10 }
  0xee   : > { %p511_p9 = pneg %p510_p7 }
  0xf0   : > { %p516_p13 = pnand %p515_p12, %p511_p9 }
  0xf2   : > { %519 = shalt.err (!%p516_p13)
}
  0xf3   : > { %438 = dma.vmem_to_hbm [thread:$0]  (%p629_p4), %s654_s7, 256, %s322_s18, %s306_s20  }
  0xf4 PF: > { %p444_p0 = scmp.ge.s32.totalorder %s570_s14, 2  ;;  %s336_s4 = sand.u32 1, %s550_s9  }
  0xf5   : > { %s337_s5 = scalar_lea.sflag [#allocation3], %s336_s4 }
  0xf6   : > { %p441_p1 = pnand %p444_p0, %p636_p8 }
  0xf8   : > { %p442_p2 = pneg %p441_p1 }
  0xfa   : > { %545 = dma.done.wait (%p442_p2), %s337_s5, 256  }
  0xfb   : > { %547 = vsyncadd (%p442_p2), %s337_s5, 4294967040  ;;  %s15_s14 = sadd.s32 1, %s570_s14   ;;  %s702_s9 = smov %s554_s10 }
  0xfc   : > { %p12_p3 = scmp.ge.s32.totalorder %s15_s14, 4   ;;  %s703_s10 = smov %s558_s11 }
  0xfd   : > { %s704_s11 = smov %s642_s22  ;;  %s705_s12 = smov %s566_s13 }
  0xfe   : > { %s706_s13 = smov %s708_s17  ;;  %14 = sbr.rel (!%p12_p3) target bundleno = 4 (0x4), region = 66 }
 0x103   :  { %342 = vsyncpa [#allocation3], 1 }
 0x104   :  { %344 = vsyncpa [#allocation3 + $0x1], 1 }

</bundles_post_ra>
